<compile_context>
chip_gen: v7x
topology: tpu7x:2x2x1
jax: 0.10.0
libtpu: 0.0.40
codegen_flags: <defaults>
</compile_context>

<pallas_src>
import functools

import numpy as np
import jax
import jax.numpy as jnp
from jax.experimental import pallas as pl
from jax.experimental.pallas import tpu as pltpu


def _round_up(x, m):
    return (x + m - 1) // m * m


# ----------------------------------------------------------------------------
# Trace-time constants: fused upsample+pad matrix, 3x3 tap shifts & masks
# ----------------------------------------------------------------------------

def make_interp_matrix(n_in, n_out):
    """Row-stochastic 1-D bilinear interp matrix, PyTorch align_corners=True."""
    m = np.zeros((n_out, n_in), np.float32)
    if n_in == 1:
        m[:, 0] = 1.0
        return m
    scale = (n_in - 1) / (n_out - 1)
    for o in range(n_out):
        src = o * scale
        i0 = min(int(np.floor(src)), n_in - 1)
        i1 = min(i0 + 1, n_in - 1)
        f = src - i0
        m[o, i0] += 1.0 - f
        m[o, i1] += f
    return m


def make_upsample_pad_matrix(h1, w1, h2, w2):
    """(H1*W1, H2*W2) matrix K^T with vec(F.pad(upsample_2x(x))) == K @ vec(x).
    Bilinear x2, align_corners=True, plus PyTorch F.pad placement (or crop)."""
    def padded_1d(n_in, n_out):
        up = make_interp_matrix(n_in, 2 * n_in)          # (2*n_in, n_in)
        lo = (n_out - 2 * n_in) // 2                     # F.pad left/top offset
        out = np.zeros((n_out, n_in), np.float32)
        for o in range(n_out):
            s = o - lo
            if 0 <= s < 2 * n_in:
                out[o] = up[s]
        return out
    k = np.kron(padded_1d(h1, h2), padded_1d(w1, w2))    # (h2*w2, h1*w1)
    return np.ascontiguousarray(k.T)                     # (h1*w1, h2*w2)


def conv3x3_tap_shifts_and_masks(h, w):
    """Static lane-roll shifts and zero-padding boundary masks for a 3x3/pad=1
    conv applied on a flat channels-first (C, H*W) layout (kh-major taps)."""
    m = h * w
    shifts, masks = [], np.zeros((9, 1, m), np.float32)
    for kh in range(3):
        for kw in range(3):
            k = kh * 3 + kw
            dh, dw = kh - 1, kw - 1
            shifts.append((-(dh * w + dw)) % m)
            valid = np.zeros((h, w), np.float32)
            valid[max(0, -dh):min(h, h - dh), max(0, -dw):min(w, w - dw)] = 1.0
            masks[k, 0] = valid.reshape(-1)
    return tuple(shifts), masks


# ----------------------------------------------------------------------------
# The single fused kernel: upsample + pad + concat + Block (+extra) + ReLU
# ----------------------------------------------------------------------------

def _up_block_kernel(x2p_ref, x1p_ref, kpt_ref, mask_ref,
                     w1_ref, b1_ref, w2s_ref, b2_ref, w3e_ref, b3e_ref,
                     o_ref, stk2_ref, stk3_ref, *, shifts, cmp_, cinp):
    f32 = jnp.float32
    bf16 = jnp.bfloat16

    def tap(x_f32, k):                        # lane roll + zero-pad mask (f32)
        s = shifts[k]
        t = pltpu.roll(x_f32, s, axis=1) if s else x_f32
        return t * mask_ref[k]

    # ---- fused bilinear x2 upsample + F.pad: one bf16 matmul; x1's channels
    #      are pre-placed at rows [C2:C2+C1], so the concat is a single add.
    x1u = jnp.dot(x1p_ref[0], kpt_ref[...], preferred_element_type=f32)
    xcat = x2p_ref[0].astype(f32) + x1u                       # (Cin, M) f32
    xcat_b16 = xcat.astype(bf16)

    # ---- conv1 1x1 (+BN) + ReLU: single (Cmid, Cin) x (Cin, M) matmul.
    h1 = jnp.dot(w1_ref[...], xcat_b16, preferred_element_type=f32)
    h1 = jnp.maximum(h1 + b1_ref[...], 0.0)                   # (Cmid, M) f32

    # ---- conv2 3x3 (+BN) + ReLU: 9 rolled taps stacked along the contraction
    #      axis (8-row-aligned scratch writes), then ONE (Cmid, 9*Cmid) matmul.
    for k in range(9):
        stk2_ref[pl.ds(k * cmp_, cmp_), :] = tap(h1, k)
    h2 = jnp.dot(w2s_ref[...], stk2_ref[...].astype(bf16),
                 preferred_element_type=f32)
    h2 = jnp.maximum(h2 + b2_ref[...], 0.0)                   # (Cmid, M) f32

    # ---- conv3 1x1 (+BN) fused with the "extra" 3x3 shortcut: stack
    #      [h2 ; 9 taps of xcat], ONE (Cout, Cmid+9*Cin) matmul,
    #      shared bias (b3 + be) and a single final ReLU.
    stk3_ref[pl.ds(0, cmp_), :] = h2
    for k in range(9):
        stk3_ref[pl.ds(cmp_ + k * cinp, cinp), :] = tap(xcat, k)
    y = jnp.dot(w3e_ref[...], stk3_ref[...].astype(bf16),
                preferred_element_type=f32)
    o_ref[0] = jnp.maximum(y + b3e_ref[...], 0.0)             # (Cout, M) lane-dense


def pallas_up_block(x2p, x1p, kpt, masks, params, shifts):
    n, cinp, m = x2p.shape
    m1 = x1p.shape[2]
    cmp_ = params["b1"].shape[0]
    cout = params["b3e"].shape[0]

    full2 = lambda shape: pl.BlockSpec(shape, lambda i: (0, 0))
    full3 = lambda shape: pl.BlockSpec(shape, lambda i: (0, 0, 0))

    return pl.pallas_call(
        functools.partial(_up_block_kernel, shifts=shifts, cmp_=cmp_, cinp=cinp),
        out_shape=jax.ShapeDtypeStruct((n, cout, m), jnp.float32),
        grid=(n,),
        in_specs=[
            pl.BlockSpec((1, cinp, m), lambda i: (i, 0, 0)),    # x2 (placed, bf16)
            pl.BlockSpec((1, cinp, m1), lambda i: (i, 0, 0)),   # x1 (placed, bf16)
            full2((m1, m)),                                     # upsample+pad matrix
            full3((9, 1, m)),                                   # 3x3 boundary masks
            full2(params["w1"].shape), full2(params["b1"].shape),
            full2(params["w2s"].shape), full2(params["b2"].shape),
            full2(params["w3e"].shape), full2(params["b3e"].shape),
        ],
        out_specs=pl.BlockSpec((1, cout, m), lambda i: (i, 0, 0)),
        scratch_shapes=[pltpu.VMEM((9 * cmp_, m), jnp.float32),
                        pltpu.VMEM((cmp_ + 9 * cinp, m), jnp.float32)],
        compiler_params=pltpu.CompilerParams(
            dimension_semantics=("parallel",)),
    )(x2p, x1p, kpt, masks,
      params["w1"], params["b1"], params["w2s"], params["b2"],
      params["w3e"], params["b3e"])


# ----------------------------------------------------------------------------
# Up.forward wrapper
# ----------------------------------------------------------------------------

@jax.jit
def up_forward(params, x1, x2):
    # x1, x2, output: NCHW (PyTorch convention).
    n, c1, h1, w1 = x1.shape
    _, c2, h2, w2 = x2.shape
    m, m1 = h2 * w2, h1 * w1
    cinp = params["w1"].shape[1]
    assert cinp == _round_up(c1 + c2, 8)

    # Channel "concat by placement": x2 -> rows [0:c2], x1 -> rows [c2:c2+c1]
    # of an 8-aligned channel slab (pad rows zero; matching weight columns are
    # zero too).  Activations go to the kernel in bf16.
    x2p = jnp.pad(x2.reshape(n, c2, m),
                  ((0, 0), (0, cinp - c2), (0, 0))).astype(jnp.bfloat16)
    x1p = jnp.pad(x1.reshape(n, c1, m1),
                  ((0, 0), (c2, cinp - c2 - c1), (0, 0))).astype(jnp.bfloat16)

    # Trace-time constants.
    kpt = jnp.asarray(make_upsample_pad_matrix(h1, w1, h2, w2), jnp.bfloat16)
    shifts, masks_np = conv3x3_tap_shifts_and_masks(h2, w2)
    masks = jnp.asarray(masks_np, jnp.float32)

    out2d = pallas_up_block(x2p, x1p, kpt, masks, params, shifts)
    return out2d.reshape(n, -1, h2, w2)


# ----------------------------------------------------------------------------
# Parameter construction: PyTorch-like init, BN folding, bf16 packing
# ----------------------------------------------------------------------------

def fold_bn(w_oihw, b_o, gamma, beta, mean, var, eps=1e-5):
    scale = gamma / np.sqrt(var + eps)
    return w_oihw * scale[:, None, None, None], (b_o - mean) * scale + beta


def init_params(key, ch_in, ch_out, c2, c1):
    """Synthetic Block(ch_in, ch_out) parameters, BN folded (running stats),
    packed for the fused channels-first kernel.  Returns (packed, reference)."""
    assert c1 + c2 == ch_in and ch_in != ch_out   # `extra` 3x3 shortcut exists
    cmid = ch_in // 2
    cmp_ = _round_up(cmid, 8)
    cinp = _round_up(ch_in, 8)
    ks = jax.random.split(key, 11)

    def conv_w(k, o, i, kh, kw):
        b = 1.0 / np.sqrt(i * kh * kw)
        return np.asarray(jax.random.uniform(k, (o, i, kh, kw), jnp.float32, -b, b))

    def conv_b(k, o, i, kh, kw):
        b = 1.0 / np.sqrt(i * kh * kw)
        return np.asarray(jax.random.uniform(k, (o,), jnp.float32, -b, b))

    def bn(k, c):
        kg, kb, km, kv = jax.random.split(k, 4)
        u = lambda kk, lo, hi: np.asarray(jax.random.uniform(kk, (c,), jnp.float32, lo, hi))
        return u(kg, 0.5, 1.5), u(kb, -0.1, 0.1), u(km, -0.1, 0.1), u(kv, 0.5, 1.5)

    w1 = conv_w(ks[0], cmid, ch_in, 1, 1);   b1 = conv_b(ks[1], cmid, ch_in, 1, 1)
    w2 = conv_w(ks[3], cmid, cmid, 3, 3);    b2 = conv_b(ks[4], cmid, cmid, 3, 3)
    w3 = conv_w(ks[6], ch_out, cmid, 1, 1);  b3 = conv_b(ks[7], ch_out, cmid, 1, 1)
    we = conv_w(ks[9], ch_out, ch_in, 3, 3); be = conv_b(ks[10], ch_out, ch_in, 3, 3)
    w1f, b1f = fold_bn(w1, b1, *bn(ks[2], cmid))
    w2f, b2f = fold_bn(w2, b2, *bn(ks[5], cmid))
    w3f, b3f = fold_bn(w3, b3, *bn(ks[8], ch_out))

    w1m, w3m = w1f[:, :, 0, 0], w3f[:, :, 0, 0]
    b3e = (b3f + be).astype(np.float32)

    # Pack: bf16 weights, 8-aligned channel slabs, taps stacked kh-major along
    # the contraction axis (matches the in-kernel scratch layout).
    w1p = np.zeros((cmp_, cinp), np.float32); w1p[:cmid, :ch_in] = w1m
    b1p = np.zeros((cmp_, 1), np.float32);    b1p[:cmid, 0] = b1f
    w2sp = np.zeros((cmp_, 9 * cmp_), np.float32)
    b2p = np.zeros((cmp_, 1), np.float32);    b2p[:cmid, 0] = b2f
    w3ep = np.zeros((ch_out, cmp_ + 9 * cinp), np.float32)
    w3ep[:, :cmid] = w3m
    for kh in range(3):
        for kw in range(3):
            k = kh * 3 + kw
            w2sp[:cmid, k * cmp_:k * cmp_ + cmid] = w2f[:, :, kh, kw]
            w3ep[:, cmp_ + k * cinp:cmp_ + k * cinp + ch_in] = we[:, :, kh, kw]
    b3ep = b3e.reshape(-1, 1)

    packed = {
        "w1": jnp.asarray(w1p, jnp.bfloat16),  "b1": jnp.asarray(b1p),
        "w2s": jnp.asarray(w2sp, jnp.bfloat16), "b2": jnp.asarray(b2p),
        "w3e": jnp.asarray(w3ep, jnp.bfloat16), "b3e": jnp.asarray(b3ep),
    }
    rb = lambda a: np.asarray(a, dtype=jnp.bfloat16).astype(np.float32)
    ref = {"w1": rb(w1m), "b1": b1f, "w2": rb(w2f), "b2": b2f,
           "w3": rb(w3m), "we": rb(we), "b3e": b3e}
    return packed, ref


# ----------------------------------------------------------------------------
# Pure-XLA f32 reference (weights pre-rounded through bf16) for a sanity check
# ----------------------------------------------------------------------------

def reference_up_forward(ref, x1, x2):
    n, c1, h1, w1 = x1.shape
    _, c2, h2, w2 = x2.shape
    kpt = jnp.asarray(np.asarray(make_upsample_pad_matrix(h1, w1, h2, w2),
                                 dtype=jnp.bfloat16).astype(np.float32))
    x1u = jnp.einsum("ncq,qp->ncp", x1.reshape(n, c1, -1), kpt)
    x = jnp.concatenate([x2, x1u.reshape(n, c1, h2, w2)], axis=1)

    def conv(t, w):
        if w.ndim == 2:   # 1x1
            return jnp.einsum("nihw,oi->nohw", t, jnp.asarray(w))
        return jax.lax.conv_general_dilated(
            t, jnp.asarray(w), (1, 1), ((1, 1), (1, 1)),
            dimension_numbers=("NCHW", "OIHW", "NCHW"))

    bias = lambda b: jnp.asarray(b)[None, :, None, None]
    h1a = jax.nn.relu(conv(x, ref["w1"]) + bias(ref["b1"]))
    h2a = jax.nn.relu(conv(h1a, ref["w2"]) + bias(ref["b2"]))
    y = conv(h2a, ref["w3"]) + conv(x, ref["we"]) + bias(ref["b3e"])
    return jax.nn.relu(y)


# ----------------------------------------------------------------------------
# Main
# ----------------------------------------------------------------------------

if __name__ == "__main__":
    key = jax.random.PRNGKey(0)
    k1, k2, kp = jax.random.split(key, 3)

    # Up(ch_in=8, ch_out=4); x1 is the low-res feature map, x2 the skip input.
    N, C1, H1, W1 = 2, 4, 8, 8
    C2, H2, W2 = 4, 16, 16
    CH_IN, CH_OUT = C1 + C2, 4

    x1 = jax.random.normal(k1, (N, C1, H1, W1), jnp.float32)
    x2 = jax.random.normal(k2, (N, C2, H2, W2), jnp.float32)
    params, ref_params = init_params(kp, CH_IN, CH_OUT, C2, C1)

    out = jax.block_until_ready(up_forward(params, x1, x2))

    assert out.shape == (N, CH_OUT, H2, W2), out.shape
    assert bool(jnp.all(jnp.isfinite(out)))
    assert bool(jnp.all(out >= 0.0))   # final ReLU

    # Loose (bf16-operand tolerance) check against the pure-XLA reference.
    ref = reference_up_forward(ref_params, x1, x2)
    rel_err = float(jnp.max(jnp.abs(out - ref) / (1.0 + jnp.abs(ref))))
    assert rel_err < 0.1, rel_err

    print("KERNEL_OK")
</pallas_src>

<mosaic_0001>
module attributes {stable_mosaic.version = 11 : i64} {
  func.func @_up_block_kernel(%arg0: i32, %arg1: memref<1x8x256xbf16, #tpu.memory_space<vmem>>, %arg2: memref<1x8x64xbf16, #tpu.memory_space<vmem>>, %arg3: memref<64x256xbf16, #tpu.memory_space<vmem>>, %arg4: memref<9x1x256xf32, #tpu.memory_space<vmem>>, %arg5: memref<8x8xbf16, #tpu.memory_space<vmem>>, %arg6: memref<8x1xf32, #tpu.memory_space<vmem>>, %arg7: memref<8x72xbf16, #tpu.memory_space<vmem>>, %arg8: memref<8x1xf32, #tpu.memory_space<vmem>>, %arg9: memref<4x80xbf16, #tpu.memory_space<vmem>>, %arg10: memref<4x1xf32, #tpu.memory_space<vmem>>, %arg11: memref<1x4x256xf32, #tpu.memory_space<vmem>>, %arg12: memref<72x256xf32, #tpu.memory_space<vmem>>, %arg13: memref<80x256xf32, #tpu.memory_space<vmem>>) attributes {dimension_semantics = [#tpu.dimension_semantics<parallel>], iteration_bounds = array<i64: 2>, scalar_prefetch = 0 : i64, scratch_operands = 2 : i64, tpu.core_type = #tpu.core_type<tc>, window_params = [{transform_indices = @transform_0, window_bounds = array<i64: 1, 8, 256>}, {transform_indices = @transform_1, window_bounds = array<i64: 1, 8, 64>}, {pipeline_mode = #tpu.pipeline_mode<synchronous>, transform_indices = @transform_2, window_bounds = array<i64: 64, 256>}, {pipeline_mode = #tpu.pipeline_mode<synchronous>, transform_indices = @transform_3, window_bounds = array<i64: 9, 1, 256>}, {pipeline_mode = #tpu.pipeline_mode<synchronous>, transform_indices = @transform_4, window_bounds = array<i64: 8, 8>}, {pipeline_mode = #tpu.pipeline_mode<synchronous>, transform_indices = @transform_5, window_bounds = array<i64: 8, 1>}, {pipeline_mode = #tpu.pipeline_mode<synchronous>, transform_indices = @transform_6, window_bounds = array<i64: 8, 72>}, {pipeline_mode = #tpu.pipeline_mode<synchronous>, transform_indices = @transform_7, window_bounds = array<i64: 8, 1>}, {pipeline_mode = #tpu.pipeline_mode<synchronous>, transform_indices = @transform_8, window_bounds = array<i64: 4, 80>}, {pipeline_mode = #tpu.pipeline_mode<synchronous>, transform_indices = @transform_9, window_bounds = array<i64: 4, 1>}, {transform_indices = @transform_10, window_bounds = array<i64: 1, 4, 256>}]} {
    %c0 = arith.constant 0 : index
    %c0_0 = arith.constant 0 : index
    %c0_1 = arith.constant 0 : index
    %0 = vector.load %arg2[%c0, %c0_0, %c0_1] : memref<1x8x64xbf16, #tpu.memory_space<vmem>>, vector<1x8x64xbf16>
    %1 = vector.shape_cast %0 : vector<1x8x64xbf16> to vector<8x64xbf16>
    %c0_2 = arith.constant 0 : index
    %c0_3 = arith.constant 0 : index
    %2 = vector.load %arg3[%c0_2, %c0_3] : memref<64x256xbf16, #tpu.memory_space<vmem>>, vector<64x256xbf16>
    %cst = arith.constant dense<0.000000e+00> : vector<8x256xf32>
    %3 = tpu.matmul %1, %2, %cst {dimension_numbers = #tpu.dot_dimension_numbers<[1], [0], [0], [1], [0, 0, 1, 1], [], []>} : vector<8x64xbf16>, vector<64x256xbf16>, vector<8x256xf32> -> vector<8x256xf32>
    %c0_4 = arith.constant 0 : index
    %c0_5 = arith.constant 0 : index
    %c0_6 = arith.constant 0 : index
    %4 = vector.load %arg1[%c0_4, %c0_5, %c0_6] : memref<1x8x256xbf16, #tpu.memory_space<vmem>>, vector<1x8x256xbf16>
    %5 = vector.shape_cast %4 : vector<1x8x256xbf16> to vector<8x256xbf16>
    %6 = arith.extf %5 : vector<8x256xbf16> to vector<8x256xf32>
    %7 = arith.addf %6, %3 : vector<8x256xf32>
    %8 = arith.truncf %7 : vector<8x256xf32> to vector<8x256xbf16>
    %c0_7 = arith.constant 0 : index
    %c0_8 = arith.constant 0 : index
    %9 = vector.load %arg5[%c0_7, %c0_8] : memref<8x8xbf16, #tpu.memory_space<vmem>>, vector<8x8xbf16>
    %cst_9 = arith.constant dense<0.000000e+00> : vector<8x256xf32>
    %10 = tpu.matmul %9, %8, %cst_9 {dimension_numbers = #tpu.dot_dimension_numbers<[1], [0], [0], [1], [0, 0, 1, 1], [], []>} : vector<8x8xbf16>, vector<8x256xbf16>, vector<8x256xf32> -> vector<8x256xf32>
    %c0_10 = arith.constant 0 : index
    %c0_11 = arith.constant 0 : index
    %11 = vector.load %arg6[%c0_10, %c0_11] : memref<8x1xf32, #tpu.memory_space<vmem>>, vector<8x1xf32>
    %12 = vector.broadcast %11 : vector<8x1xf32> to vector<8x256xf32>
    %13 = arith.addf %10, %12 : vector<8x256xf32>
    %cst_12 = arith.constant 0.000000e+00 : f32
    %14 = vector.broadcast %cst_12 : f32 to vector<8x256xf32>
    %15 = arith.maximumf %13, %14 : vector<8x256xf32>
    %c17_i32 = arith.constant 17 : i32
    %16 = tpu.dynamic_rotate %15 by %c17_i32 dim 1 : vector<8x256xf32>, i32 -> vector<8x256xf32>
    %c0_13 = arith.constant 0 : index
    %c0_14 = arith.constant 0 : index
    %c0_15 = arith.constant 0 : index
    %17 = vector.load %arg4[%c0_13, %c0_14, %c0_15] : memref<9x1x256xf32, #tpu.memory_space<vmem>>, vector<1x1x256xf32>
    %18 = vector.shape_cast %17 : vector<1x1x256xf32> to vector<1x256xf32>
    %19 = vector.broadcast %18 : vector<1x256xf32> to vector<8x256xf32>
    %20 = arith.mulf %16, %19 : vector<8x256xf32>
    %c0_16 = arith.constant 0 : index
    %c0_17 = arith.constant 0 : index
    %21 = vector.load %arg12[%c0_16, %c0_17] : memref<72x256xf32, #tpu.memory_space<vmem>>, vector<8x256xf32>
    tpu.vector_store %arg12[%c0_16, %c0_17], %20 {strides = array<i32>} : memref<72x256xf32, #tpu.memory_space<vmem>>, vector<8x256xf32>,
    %c16_i32 = arith.constant 16 : i32
    %22 = tpu.dynamic_rotate %15 by %c16_i32 dim 1 : vector<8x256xf32>, i32 -> vector<8x256xf32>
    %c1 = arith.constant 1 : index
    %c0_18 = arith.constant 0 : index
    %c0_19 = arith.constant 0 : index
    %23 = vector.load %arg4[%c1, %c0_18, %c0_19] : memref<9x1x256xf32, #tpu.memory_space<vmem>>, vector<1x1x256xf32>
    %24 = vector.shape_cast %23 : vector<1x1x256xf32> to vector<1x256xf32>
    %25 = vector.broadcast %24 : vector<1x256xf32> to vector<8x256xf32>
    %26 = arith.mulf %22, %25 : vector<8x256xf32>
    %c8 = arith.constant 8 : index
    %c0_20 = arith.constant 0 : index
    %27 = vector.load %arg12[%c8, %c0_20] : memref<72x256xf32, #tpu.memory_space<vmem>>, vector<8x256xf32>
    tpu.vector_store %arg12[%c8, %c0_20], %26 {strides = array<i32>} : memref<72x256xf32, #tpu.memory_space<vmem>>, vector<8x256xf32>,
    %c15_i32 = arith.constant 15 : i32
    %28 = tpu.dynamic_rotate %15 by %c15_i32 dim 1 : vector<8x256xf32>, i32 -> vector<8x256xf32>
    %c2 = arith.constant 2 : index
    %c0_21 = arith.constant 0 : index
    %c0_22 = arith.constant 0 : index
    %29 = vector.load %arg4[%c2, %c0_21, %c0_22] : memref<9x1x256xf32, #tpu.memory_space<vmem>>, vector<1x1x256xf32>
    %30 = vector.shape_cast %29 : vector<1x1x256xf32> to vector<1x256xf32>
    %31 = vector.broadcast %30 : vector<1x256xf32> to vector<8x256xf32>
    %32 = arith.mulf %28, %31 : vector<8x256xf32>
    %c16 = arith.constant 16 : index
    %c0_23 = arith.constant 0 : index
    %33 = vector.load %arg12[%c16, %c0_23] : memref<72x256xf32, #tpu.memory_space<vmem>>, vector<8x256xf32>
    tpu.vector_store %arg12[%c16, %c0_23], %32 {strides = array<i32>} : memref<72x256xf32, #tpu.memory_space<vmem>>, vector<8x256xf32>,
    %c1_i32 = arith.constant 1 : i32
    %34 = tpu.dynamic_rotate %15 by %c1_i32 dim 1 : vector<8x256xf32>, i32 -> vector<8x256xf32>
    %c3 = arith.constant 3 : index
    %c0_24 = arith.constant 0 : index
    %c0_25 = arith.constant 0 : index
    %35 = vector.load %arg4[%c3, %c0_24, %c0_25] : memref<9x1x256xf32, #tpu.memory_space<vmem>>, vector<1x1x256xf32>
    %36 = vector.shape_cast %35 : vector<1x1x256xf32> to vector<1x256xf32>
    %37 = vector.broadcast %36 : vector<1x256xf32> to vector<8x256xf32>
    %38 = arith.mulf %34, %37 : vector<8x256xf32>
    %c24 = arith.constant 24 : index
    %c0_26 = arith.constant 0 : index
    %39 = vector.load %arg12[%c24, %c0_26] : memref<72x256xf32, #tpu.memory_space<vmem>>, vector<8x256xf32>
    tpu.vector_store %arg12[%c24, %c0_26], %38 {strides = array<i32>} : memref<72x256xf32, #tpu.memory_space<vmem>>, vector<8x256xf32>,
    %c4 = arith.constant 4 : index
    %c0_27 = arith.constant 0 : index
    %c0_28 = arith.constant 0 : index
    %40 = vector.load %arg4[%c4, %c0_27, %c0_28] : memref<9x1x256xf32, #tpu.memory_space<vmem>>, vector<1x1x256xf32>
    %41 = vector.shape_cast %40 : vector<1x1x256xf32> to vector<1x256xf32>
    %42 = vector.broadcast %41 : vector<1x256xf32> to vector<8x256xf32>
    %43 = arith.mulf %15, %42 : vector<8x256xf32>
    %c32 = arith.constant 32 : index
    %c0_29 = arith.constant 0 : index
    %44 = vector.load %arg12[%c32, %c0_29] : memref<72x256xf32, #tpu.memory_space<vmem>>, vector<8x256xf32>
    tpu.vector_store %arg12[%c32, %c0_29], %43 {strides = array<i32>} : memref<72x256xf32, #tpu.memory_space<vmem>>, vector<8x256xf32>,
    %c255_i32 = arith.constant 255 : i32
    %45 = tpu.dynamic_rotate %15 by %c255_i32 dim 1 : vector<8x256xf32>, i32 -> vector<8x256xf32>
    %c5 = arith.constant 5 : index
    %c0_30 = arith.constant 0 : index
    %c0_31 = arith.constant 0 : index
    %46 = vector.load %arg4[%c5, %c0_30, %c0_31] : memref<9x1x256xf32, #tpu.memory_space<vmem>>, vector<1x1x256xf32>
    %47 = vector.shape_cast %46 : vector<1x1x256xf32> to vector<1x256xf32>
    %48 = vector.broadcast %47 : vector<1x256xf32> to vector<8x256xf32>
    %49 = arith.mulf %45, %48 : vector<8x256xf32>
    %c40 = arith.constant 40 : index
    %c0_32 = arith.constant 0 : index
    %50 = vector.load %arg12[%c40, %c0_32] : memref<72x256xf32, #tpu.memory_space<vmem>>, vector<8x256xf32>
    tpu.vector_store %arg12[%c40, %c0_32], %49 {strides = array<i32>} : memref<72x256xf32, #tpu.memory_space<vmem>>, vector<8x256xf32>,
    %c241_i32 = arith.constant 241 : i32
    %51 = tpu.dynamic_rotate %15 by %c241_i32 dim 1 : vector<8x256xf32>, i32 -> vector<8x256xf32>
    %c6 = arith.constant 6 : index
    %c0_33 = arith.constant 0 : index
    %c0_34 = arith.constant 0 : index
    %52 = vector.load %arg4[%c6, %c0_33, %c0_34] : memref<9x1x256xf32, #tpu.memory_space<vmem>>, vector<1x1x256xf32>
    %53 = vector.shape_cast %52 : vector<1x1x256xf32> to vector<1x256xf32>
    %54 = vector.broadcast %53 : vector<1x256xf32> to vector<8x256xf32>
    %55 = arith.mulf %51, %54 : vector<8x256xf32>
    %c48 = arith.constant 48 : index
    %c0_35 = arith.constant 0 : index
    %56 = vector.load %arg12[%c48, %c0_35] : memref<72x256xf32, #tpu.memory_space<vmem>>, vector<8x256xf32>
    tpu.vector_store %arg12[%c48, %c0_35], %55 {strides = array<i32>} : memref<72x256xf32, #tpu.memory_space<vmem>>, vector<8x256xf32>,
    %c240_i32 = arith.constant 240 : i32
    %57 = tpu.dynamic_rotate %15 by %c240_i32 dim 1 : vector<8x256xf32>, i32 -> vector<8x256xf32>
    %c7 = arith.constant 7 : index
    %c0_36 = arith.constant 0 : index
    %c0_37 = arith.constant 0 : index
    %58 = vector.load %arg4[%c7, %c0_36, %c0_37] : memref<9x1x256xf32, #tpu.memory_space<vmem>>, vector<1x1x256xf32>
    %59 = vector.shape_cast %58 : vector<1x1x256xf32> to vector<1x256xf32>
    %60 = vector.broadcast %59 : vector<1x256xf32> to vector<8x256xf32>
    %61 = arith.mulf %57, %60 : vector<8x256xf32>
    %c56 = arith.constant 56 : index
    %c0_38 = arith.constant 0 : index
    %62 = vector.load %arg12[%c56, %c0_38] : memref<72x256xf32, #tpu.memory_space<vmem>>, vector<8x256xf32>
    tpu.vector_store %arg12[%c56, %c0_38], %61 {strides = array<i32>} : memref<72x256xf32, #tpu.memory_space<vmem>>, vector<8x256xf32>,
    %c239_i32 = arith.constant 239 : i32
    %63 = tpu.dynamic_rotate %15 by %c239_i32 dim 1 : vector<8x256xf32>, i32 -> vector<8x256xf32>
    %c8_39 = arith.constant 8 : index
    %c0_40 = arith.constant 0 : index
    %c0_41 = arith.constant 0 : index
    %64 = vector.load %arg4[%c8_39, %c0_40, %c0_41] : memref<9x1x256xf32, #tpu.memory_space<vmem>>, vector<1x1x256xf32>
    %65 = vector.shape_cast %64 : vector<1x1x256xf32> to vector<1x256xf32>
    %66 = vector.broadcast %65 : vector<1x256xf32> to vector<8x256xf32>
    %67 = arith.mulf %63, %66 : vector<8x256xf32>
    %c64 = arith.constant 64 : index
    %c0_42 = arith.constant 0 : index
    %68 = vector.load %arg12[%c64, %c0_42] : memref<72x256xf32, #tpu.memory_space<vmem>>, vector<8x256xf32>
    tpu.vector_store %arg12[%c64, %c0_42], %67 {strides = array<i32>} : memref<72x256xf32, #tpu.memory_space<vmem>>, vector<8x256xf32>,
    %c0_43 = arith.constant 0 : index
    %c0_44 = arith.constant 0 : index
    %69 = vector.load %arg7[%c0_43, %c0_44] : memref<8x72xbf16, #tpu.memory_space<vmem>>, vector<8x72xbf16>
    %c0_45 = arith.constant 0 : index
    %c0_46 = arith.constant 0 : index
    %70 = vector.load %arg12[%c0_45, %c0_46] : memref<72x256xf32, #tpu.memory_space<vmem>>, vector<72x256xf32>
    %71 = arith.truncf %70 : vector<72x256xf32> to vector<72x256xbf16>
    %cst_47 = arith.constant dense<0.000000e+00> : vector<8x256xf32>
    %72 = tpu.matmul %69, %71, %cst_47 {dimension_numbers = #tpu.dot_dimension_numbers<[1], [0], [0], [1], [0, 0, 1, 1], [], []>} : vector<8x72xbf16>, vector<72x256xbf16>, vector<8x256xf32> -> vector<8x256xf32>
    %c0_48 = arith.constant 0 : index
    %c0_49 = arith.constant 0 : index
    %73 = vector.load %arg8[%c0_48, %c0_49] : memref<8x1xf32, #tpu.memory_space<vmem>>, vector<8x1xf32>
    %74 = vector.broadcast %73 : vector<8x1xf32> to vector<8x256xf32>
    %75 = arith.addf %72, %74 : vector<8x256xf32>
    %cst_50 = arith.constant 0.000000e+00 : f32
    %76 = vector.broadcast %cst_50 : f32 to vector<8x256xf32>
    %77 = arith.maximumf %75, %76 : vector<8x256xf32>
    %c0_51 = arith.constant 0 : index
    %c0_52 = arith.constant 0 : index
    %78 = vector.load %arg13[%c0_51, %c0_52] : memref<80x256xf32, #tpu.memory_space<vmem>>, vector<8x256xf32>
    tpu.vector_store %arg13[%c0_51, %c0_52], %77 {strides = array<i32>} : memref<80x256xf32, #tpu.memory_space<vmem>>, vector<8x256xf32>,
    %c17_i32_53 = arith.constant 17 : i32
    %79 = tpu.dynamic_rotate %7 by %c17_i32_53 dim 1 : vector<8x256xf32>, i32 -> vector<8x256xf32>
    %c0_54 = arith.constant 0 : index
    %c0_55 = arith.constant 0 : index
    %c0_56 = arith.constant 0 : index
    %80 = vector.load %arg4[%c0_54, %c0_55, %c0_56] : memref<9x1x256xf32, #tpu.memory_space<vmem>>, vector<1x1x256xf32>
    %81 = vector.shape_cast %80 : vector<1x1x256xf32> to vector<1x256xf32>
    %82 = vector.broadcast %81 : vector<1x256xf32> to vector<8x256xf32>
    %83 = arith.mulf %79, %82 : vector<8x256xf32>
    %c8_57 = arith.constant 8 : index
    %c0_58 = arith.constant 0 : index
    %84 = vector.load %arg13[%c8_57, %c0_58] : memref<80x256xf32, #tpu.memory_space<vmem>>, vector<8x256xf32>
    tpu.vector_store %arg13[%c8_57, %c0_58], %83 {strides = array<i32>} : memref<80x256xf32, #tpu.memory_space<vmem>>, vector<8x256xf32>,
    %c16_i32_59 = arith.constant 16 : i32
    %85 = tpu.dynamic_rotate %7 by %c16_i32_59 dim 1 : vector<8x256xf32>, i32 -> vector<8x256xf32>
    %c1_60 = arith.constant 1 : index
    %c0_61 = arith.constant 0 : index
    %c0_62 = arith.constant 0 : index
    %86 = vector.load %arg4[%c1_60, %c0_61, %c0_62] : memref<9x1x256xf32, #tpu.memory_space<vmem>>, vector<1x1x256xf32>
    %87 = vector.shape_cast %86 : vector<1x1x256xf32> to vector<1x256xf32>
    %88 = vector.broadcast %87 : vector<1x256xf32> to vector<8x256xf32>
    %89 = arith.mulf %85, %88 : vector<8x256xf32>
    %c16_63 = arith.constant 16 : index
    %c0_64 = arith.constant 0 : index
    %90 = vector.load %arg13[%c16_63, %c0_64] : memref<80x256xf32, #tpu.memory_space<vmem>>, vector<8x256xf32>
    tpu.vector_store %arg13[%c16_63, %c0_64], %89 {strides = array<i32>} : memref<80x256xf32, #tpu.memory_space<vmem>>, vector<8x256xf32>,
    %c15_i32_65 = arith.constant 15 : i32
    %91 = tpu.dynamic_rotate %7 by %c15_i32_65 dim 1 : vector<8x256xf32>, i32 -> vector<8x256xf32>
    %c2_66 = arith.constant 2 : index
    %c0_67 = arith.constant 0 : index
    %c0_68 = arith.constant 0 : index
    %92 = vector.load %arg4[%c2_66, %c0_67, %c0_68] : memref<9x1x256xf32, #tpu.memory_space<vmem>>, vector<1x1x256xf32>
    %93 = vector.shape_cast %92 : vector<1x1x256xf32> to vector<1x256xf32>
    %94 = vector.broadcast %93 : vector<1x256xf32> to vector<8x256xf32>
    %95 = arith.mulf %91, %94 : vector<8x256xf32>
    %c24_69 = arith.constant 24 : index
    %c0_70 = arith.constant 0 : index
    %96 = vector.load %arg13[%c24_69, %c0_70] : memref<80x256xf32, #tpu.memory_space<vmem>>, vector<8x256xf32>
    tpu.vector_store %arg13[%c24_69, %c0_70], %95 {strides = array<i32>} : memref<80x256xf32, #tpu.memory_space<vmem>>, vector<8x256xf32>,
    %c1_i32_71 = arith.constant 1 : i32
    %97 = tpu.dynamic_rotate %7 by %c1_i32_71 dim 1 : vector<8x256xf32>, i32 -> vector<8x256xf32>
    %c3_72 = arith.constant 3 : index
    %c0_73 = arith.constant 0 : index
    %c0_74 = arith.constant 0 : index
    %98 = vector.load %arg4[%c3_72, %c0_73, %c0_74] : memref<9x1x256xf32, #tpu.memory_space<vmem>>, vector<1x1x256xf32>
    %99 = vector.shape_cast %98 : vector<1x1x256xf32> to vector<1x256xf32>
    %100 = vector.broadcast %99 : vector<1x256xf32> to vector<8x256xf32>
    %101 = arith.mulf %97, %100 : vector<8x256xf32>
    %c32_75 = arith.constant 32 : index
    %c0_76 = arith.constant 0 : index
    %102 = vector.load %arg13[%c32_75, %c0_76] : memref<80x256xf32, #tpu.memory_space<vmem>>, vector<8x256xf32>
    tpu.vector_store %arg13[%c32_75, %c0_76], %101 {strides = array<i32>} : memref<80x256xf32, #tpu.memory_space<vmem>>, vector<8x256xf32>,
    %c4_77 = arith.constant 4 : index
    %c0_78 = arith.constant 0 : index
    %c0_79 = arith.constant 0 : index
    %103 = vector.load %arg4[%c4_77, %c0_78, %c0_79] : memref<9x1x256xf32, #tpu.memory_space<vmem>>, vector<1x1x256xf32>
    %104 = vector.shape_cast %103 : vector<1x1x256xf32> to vector<1x256xf32>
    %105 = vector.broadcast %104 : vector<1x256xf32> to vector<8x256xf32>
    %106 = arith.mulf %7, %105 : vector<8x256xf32>
    %c40_80 = arith.constant 40 : index
    %c0_81 = arith.constant 0 : index
    %107 = vector.load %arg13[%c40_80, %c0_81] : memref<80x256xf32, #tpu.memory_space<vmem>>, vector<8x256xf32>
    tpu.vector_store %arg13[%c40_80, %c0_81], %106 {strides = array<i32>} : memref<80x256xf32, #tpu.memory_space<vmem>>, vector<8x256xf32>,
    %c255_i32_82 = arith.constant 255 : i32
    %108 = tpu.dynamic_rotate %7 by %c255_i32_82 dim 1 : vector<8x256xf32>, i32 -> vector<8x256xf32>
    %c5_83 = arith.constant 5 : index
    %c0_84 = arith.constant 0 : index
    %c0_85 = arith.constant 0 : index
    %109 = vector.load %arg4[%c5_83, %c0_84, %c0_85] : memref<9x1x256xf32, #tpu.memory_space<vmem>>, vector<1x1x256xf32>
    %110 = vector.shape_cast %109 : vector<1x1x256xf32> to vector<1x256xf32>
    %111 = vector.broadcast %110 : vector<1x256xf32> to vector<8x256xf32>
    %112 = arith.mulf %108, %111 : vector<8x256xf32>
    %c48_86 = arith.constant 48 : index
    %c0_87 = arith.constant 0 : index
    %113 = vector.load %arg13[%c48_86, %c0_87] : memref<80x256xf32, #tpu.memory_space<vmem>>, vector<8x256xf32>
    tpu.vector_store %arg13[%c48_86, %c0_87], %112 {strides = array<i32>} : memref<80x256xf32, #tpu.memory_space<vmem>>, vector<8x256xf32>,
    %c241_i32_88 = arith.constant 241 : i32
    %114 = tpu.dynamic_rotate %7 by %c241_i32_88 dim 1 : vector<8x256xf32>, i32 -> vector<8x256xf32>
    %c6_89 = arith.constant 6 : index
    %c0_90 = arith.constant 0 : index
    %c0_91 = arith.constant 0 : index
    %115 = vector.load %arg4[%c6_89, %c0_90, %c0_91] : memref<9x1x256xf32, #tpu.memory_space<vmem>>, vector<1x1x256xf32>
    %116 = vector.shape_cast %115 : vector<1x1x256xf32> to vector<1x256xf32>
    %117 = vector.broadcast %116 : vector<1x256xf32> to vector<8x256xf32>
    %118 = arith.mulf %114, %117 : vector<8x256xf32>
    %c56_92 = arith.constant 56 : index
    %c0_93 = arith.constant 0 : index
    %119 = vector.load %arg13[%c56_92, %c0_93] : memref<80x256xf32, #tpu.memory_space<vmem>>, vector<8x256xf32>
    tpu.vector_store %arg13[%c56_92, %c0_93], %118 {strides = array<i32>} : memref<80x256xf32, #tpu.memory_space<vmem>>, vector<8x256xf32>,
    %c240_i32_94 = arith.constant 240 : i32
    %120 = tpu.dynamic_rotate %7 by %c240_i32_94 dim 1 : vector<8x256xf32>, i32 -> vector<8x256xf32>
    %c7_95 = arith.constant 7 : index
    %c0_96 = arith.constant 0 : index
    %c0_97 = arith.constant 0 : index
    %121 = vector.load %arg4[%c7_95, %c0_96, %c0_97] : memref<9x1x256xf32, #tpu.memory_space<vmem>>, vector<1x1x256xf32>
    %122 = vector.shape_cast %121 : vector<1x1x256xf32> to vector<1x256xf32>
    %123 = vector.broadcast %122 : vector<1x256xf32> to vector<8x256xf32>
    %124 = arith.mulf %120, %123 : vector<8x256xf32>
    %c64_98 = arith.constant 64 : index
    %c0_99 = arith.constant 0 : index
    %125 = vector.load %arg13[%c64_98, %c0_99] : memref<80x256xf32, #tpu.memory_space<vmem>>, vector<8x256xf32>
    tpu.vector_store %arg13[%c64_98, %c0_99], %124 {strides = array<i32>} : memref<80x256xf32, #tpu.memory_space<vmem>>, vector<8x256xf32>,
    %c239_i32_100 = arith.constant 239 : i32
    %126 = tpu.dynamic_rotate %7 by %c239_i32_100 dim 1 : vector<8x256xf32>, i32 -> vector<8x256xf32>
    %c8_101 = arith.constant 8 : index
    %c0_102 = arith.constant 0 : index
    %c0_103 = arith.constant 0 : index
    %127 = vector.load %arg4[%c8_101, %c0_102, %c0_103] : memref<9x1x256xf32, #tpu.memory_space<vmem>>, vector<1x1x256xf32>
    %128 = vector.shape_cast %127 : vector<1x1x256xf32> to vector<1x256xf32>
    %129 = vector.broadcast %128 : vector<1x256xf32> to vector<8x256xf32>
    %130 = arith.mulf %126, %129 : vector<8x256xf32>
    %c72 = arith.constant 72 : index
    %c0_104 = arith.constant 0 : index
    %131 = vector.load %arg13[%c72, %c0_104] : memref<80x256xf32, #tpu.memory_space<vmem>>, vector<8x256xf32>
    tpu.vector_store %arg13[%c72, %c0_104], %130 {strides = array<i32>} : memref<80x256xf32, #tpu.memory_space<vmem>>, vector<8x256xf32>,
    %c0_105 = arith.constant 0 : index
    %c0_106 = arith.constant 0 : index
    %132 = vector.load %arg9[%c0_105, %c0_106] : memref<4x80xbf16, #tpu.memory_space<vmem>>, vector<4x80xbf16>
    %c0_107 = arith.constant 0 : index
    %c0_108 = arith.constant 0 : index
    %133 = vector.load %arg13[%c0_107, %c0_108] : memref<80x256xf32, #tpu.memory_space<vmem>>, vector<80x256xf32>
    %134 = arith.truncf %133 : vector<80x256xf32> to vector<80x256xbf16>
    %cst_109 = arith.constant dense<0.000000e+00> : vector<4x256xf32>
    %135 = tpu.matmul %132, %134, %cst_109 {dimension_numbers = #tpu.dot_dimension_numbers<[1], [0], [0], [1], [0, 0, 1, 1], [], []>} : vector<4x80xbf16>, vector<80x256xbf16>, vector<4x256xf32> -> vector<4x256xf32>
    %c0_110 = arith.constant 0 : index
    %c0_111 = arith.constant 0 : index
    %136 = vector.load %arg10[%c0_110, %c0_111] : memref<4x1xf32, #tpu.memory_space<vmem>>, vector<4x1xf32>
    %137 = vector.broadcast %136 : vector<4x1xf32> to vector<4x256xf32>
    %138 = arith.addf %135, %137 : vector<4x256xf32>
    %cst_112 = arith.constant 0.000000e+00 : f32
    %139 = vector.broadcast %cst_112 : f32 to vector<4x256xf32>
    %140 = arith.maximumf %138, %139 : vector<4x256xf32>
    %c0_113 = arith.constant 0 : index
    %c0_114 = arith.constant 0 : index
    %c0_115 = arith.constant 0 : index
    %141 = vector.load %arg11[%c0_113, %c0_114, %c0_115] : memref<1x4x256xf32, #tpu.memory_space<vmem>>, vector<1x4x256xf32>
    %142 = vector.shape_cast %141 : vector<1x4x256xf32> to vector<4x256xf32>
    %143 = vector.shape_cast %140 : vector<4x256xf32> to vector<1x4x256xf32>
    tpu.vector_store %arg11[%c0_113, %c0_114, %c0_115], %143 {strides = array<i32>} : memref<1x4x256xf32, #tpu.memory_space<vmem>>, vector<1x4x256xf32>,
    return
  }
  func.func @transform_0(%arg0: i32) -> (i32, i32, i32) {
    %c0_i32 = arith.constant 0 : i32
    %c0_i32_0 = arith.constant 0 : i32
    %c0_i32_1 = arith.constant 0 : i32
    return %arg0, %c0_i32, %c0_i32_0 : i32, i32, i32
  }
  func.func @transform_1(%arg0: i32) -> (i32, i32, i32) {
    %c0_i32 = arith.constant 0 : i32
    %c0_i32_0 = arith.constant 0 : i32
    %c0_i32_1 = arith.constant 0 : i32
    return %arg0, %c0_i32, %c0_i32_0 : i32, i32, i32
  }
  func.func @transform_2(%arg0: i32) -> (i32, i32) {
    %c0_i32 = arith.constant 0 : i32
    %c0_i32_0 = arith.constant 0 : i32
    %c0_i32_1 = arith.constant 0 : i32
    return %c0_i32, %c0_i32_0 : i32, i32
  }
  func.func @transform_3(%arg0: i32) -> (i32, i32, i32) {
    %c0_i32 = arith.constant 0 : i32
    %c0_i32_0 = arith.constant 0 : i32
    %c0_i32_1 = arith.constant 0 : i32
    %c0_i32_2 = arith.constant 0 : i32
    return %c0_i32, %c0_i32_0, %c0_i32_1 : i32, i32, i32
  }
  func.func @transform_4(%arg0: i32) -> (i32, i32) {
    %c0_i32 = arith.constant 0 : i32
    %c0_i32_0 = arith.constant 0 : i32
    %c0_i32_1 = arith.constant 0 : i32
    return %c0_i32, %c0_i32_0 : i32, i32
  }
  func.func @transform_5(%arg0: i32) -> (i32, i32) {
    %c0_i32 = arith.constant 0 : i32
    %c0_i32_0 = arith.constant 0 : i32
    %c0_i32_1 = arith.constant 0 : i32
    return %c0_i32, %c0_i32_0 : i32, i32
  }
  func.func @transform_6(%arg0: i32) -> (i32, i32) {
    %c0_i32 = arith.constant 0 : i32
    %c0_i32_0 = arith.constant 0 : i32
    %c0_i32_1 = arith.constant 0 : i32
    return %c0_i32, %c0_i32_0 : i32, i32
  }
  func.func @transform_7(%arg0: i32) -> (i32, i32) {
    %c0_i32 = arith.constant 0 : i32
    %c0_i32_0 = arith.constant 0 : i32
    %c0_i32_1 = arith.constant 0 : i32
    return %c0_i32, %c0_i32_0 : i32, i32
  }
  func.func @transform_8(%arg0: i32) -> (i32, i32) {
    %c0_i32 = arith.constant 0 : i32
    %c0_i32_0 = arith.constant 0 : i32
    %c0_i32_1 = arith.constant 0 : i32
    return %c0_i32, %c0_i32_0 : i32, i32
  }
  func.func @transform_9(%arg0: i32) -> (i32, i32) {
    %c0_i32 = arith.constant 0 : i32
    %c0_i32_0 = arith.constant 0 : i32
    %c0_i32_1 = arith.constant 0 : i32
    return %c0_i32, %c0_i32_0 : i32, i32
  }
  func.func @transform_10(%arg0: i32) -> (i32, i32, i32) {
    %c0_i32 = arith.constant 0 : i32
    %c0_i32_0 = arith.constant 0 : i32
    %c0_i32_1 = arith.constant 0 : i32
    return %arg0, %c0_i32, %c0_i32_0 : i32, i32, i32
  }
}

</mosaic_0001>

<bundles_post_ra>
// kernel: up_forward.1
= control target key start
LH: loop header
LB: loop body
LE: loop exit
PB: predicated region body
PF: predicated region fallthrough
CT: control target
= control target key end

     0   :  { %s1335_s13 = smov 0   ;;  %s1666_s0 = inlined_call_operand.vmem [shape: bf16[2,8,256], index: 0, kind: input, shape index: {}]   ;;  %s1667_s1 = inlined_call_operand.vmem [shape: bf16[2,8,64], index: 1, kind: input, shape index: {}]   ;;  %s1668_s2 = inlined_call_operand.vmem [shape: bf16[64,256], index: 2, kind: input, shape index: {}]   ;;  %s1669_s3 = inlined_call_operand.vmem [shape: f32[9,1,256], index: 3, kind: input, shape index: {}]   ;;  %s1670_s4 = inlined_call_operand.vmem [shape: bf16[8,8], index: 4, kind: input, shape index: {}]   ;;  %s1671_s5 = inlined_call_operand.vmem [shape: f32[8,1], index: 5, kind: input, shape index: {}]   ;;  %s1672_s6 = inlined_call_operand.vmem [shape: bf16[8,72], index: 6, kind: input, shape index: {}]   ;;  %s1673_s7 = inlined_call_operand.vmem [shape: f32[8,1], index: 7, kind: input, shape index: {}]   ;;  %s1674_s8 = inlined_call_operand.vmem [shape: bf16[4,80], index: 8, kind: input, shape index: {}]   ;;  %s1675_s9 = inlined_call_operand.vmem [shape: f32[4,1], index: 9, kind: input, shape index: {}]   ;;  %s1676_s10 = inlined_call_operand.vmem [shape: f32[2,4,256], index: 10, kind: output, shape index: {}]  }
   0x1 LB: > { %s1188_s14 = sadd.s32 4294967295, %s1269_s13   ;;  %p1192_p0 = scmp.ge.s32.totalorder %s1269_s13, 1  ;;  %s1269_s13 = sphi %s1335_s13, %s20_s13  }
   0x2   : > { %p321_p1 = scmp.lt.s32.totalorder %s1269_s13, 3 }
   0x4   : > { %p322_p2 = pnand %p1192_p0, %p321_p1 }
   0x5   : > { %v1251_v0 = vld [vmem:[%s1668_s2 + $0x4] ss:$8 sps:$4 sm:$0xff] (!%p322_p2)   ;;  %v1253_v1 = vld [vmem:[%s1668_s2] ss:$8 sps:$4 sm:$0xff] (!%p322_p2)   ;;  %v1271_v2 = vmov (!%p322_p2), 0   ;;  %p363_p3 = scmp.lt.s32.totalorder (!%p322_p2), %s1188_s14, 1  ;;  %v544_v35 = vlaneseq (!%p322_p2) }
   0x6   : > { %325 = sbr.rel (%p322_p2) target bundleno = 1071 (0x42f), region = 60  ;;  %463 = vmatprep.mubr.bf16.mxu0 (!%p322_p2), %v1271_v2  ;;  %529 = vmatprep.mubr.bf16.mxu1 (!%p322_p2), %v1271_v2  ;;  %v1254_v3 = vld [vmem:[%s1668_s2 + $0x14] ss:$8 sps:$4 sm:$0xff] (!%p322_p2)   ;;  %v1256_v4 = vld [vmem:[%s1668_s2 + $0x10] ss:$8 sps:$4 sm:$0xff] (!%p322_p2)   ;;  %vm427_vm0 = vcmask (!%p322_p2), 523264  }
   0x7   : > { %431 = vmatprep.subr.bf16.mxu0 (!%p322_p2), %v1251_v0  ;;  %1249 = vset.pattern.permute.xlu0 (!%p322_p2), %v1271_v2  ;;  %v1257_v5 = vld [vmem:[%s1668_s2 + $0x24] ss:$8 sps:$4 sm:$0xff] (!%p322_p2)   ;;  %v1259_v6 = vld [vmem:[%s1668_s2 + $0x20] ss:$8 sps:$4 sm:$0xff] (!%p322_p2)   ;;  %v1260_v7 = vld [vmem:[%s1668_s2 + $0x34] ss:$8 sps:$4 sm:$0xff] (!%p322_p2)  }
   0x8   : > { %432 = vmatpush1.bf16.msra.mxu0 (!%p322_p2), %v1253_v1  ;;  %1250 = vset.pattern.permute.xlu1 (!%p322_p2), %v1271_v2  ;;  %v1262_v8 = vld [vmem:[%s1668_s2 + $0x30] ss:$8 sps:$4 sm:$0xff] (!%p322_p2)   ;;  %v480_v10 = vld [vmem:[%s1671_s5] sm:$0xff] (!%p322_p2)  ;;  %vm490_vm1 = vcmask (!%p322_p2), 1043456   ;;  %vm486_vm2 = vcmask (!%p322_p2), 64512   ;;  %s1272_s25 = smov (!%p322_p2), 16  }
   0x9   : > { %433 = vmatprep.subr.bf16.mxu0 (!%p322_p2), %v1254_v3  ;;  %483 = vperm.xlu0 (!%p322_p2), %1249, %v480_v10   ;;  %v479_v23 = vld [vmem:[%s1670_s4] sm:$0xf] (!%p322_p2)  ;;  %s1273_s26 = smov (!%p322_p2), 17   ;;  %s1274_s27 = smov (!%p322_p2), 15   ;;  %v1437_v38 = vand.u32 (!%p322_p2), 127, %v544_v35  ;;  %v552_v39 = vshrl.u32 (!%p322_p2), %v544_v35, 7 }
   0xa   : > { %s1275_s28 = smov (!%p322_p2), 1   ;;  %s1277_s30 = smov (!%p322_p2), 113   ;;  %v779_v33 = vld [vmem:[%s1673_s7] sm:$0xff] (!%p322_p2)  ;;  %v1213_v54 = vld [vmem:[%s1669_s3 + $0xa] sm:$0x3] (!%p322_p2)  ;;  %vm785_vm11 = vcmask (!%p322_p2), 588800  }
   0xb   : > { %s1278_s11 = smov (!%p322_p2), 112   ;;  %s1279_s12 = smov (!%p322_p2), 111   ;;  %v1063_v34 = vld [vmem:[%s1675_s9] sm:$0xf] (!%p322_p2)  ;;  %v1442_v43 = vsub.s32 (!%p322_p2), 0, %v552_v39  ;;  %v1444_v44 = vsub.s32 (!%p322_p2), 1, %v552_v39 }
   0xc   : > { %434 = vmatpush1.bf16.msra.mxu0 (!%p322_p2), %v1256_v4  ;;  %v1209_v42 = vld [vmem:[%s1669_s3 + $0x2] sm:$0x3] (!%p322_p2)  ;;  %vm569_vm3 = vcmp.lt.s32.totalorder (!%p322_p2), %v1437_v38, 16  ;;  %v549_v45 = vld [vmem:[%s1669_s3] sm:$0x3] (!%p322_p2)  ;;  %vm593_vm4 = vcmp.lt.s32.totalorder (!%p322_p2), %v1437_v38, 15 }
   0xd   : > { %s1678_s14 = smov (!%p363_p3, %s1188_s14), 1  ;;  %435 = vmatprep.subr.bf16.mxu0 %v1257_v5  ;;  %v1211_v46 = vld [vmem:[%s1669_s3 + $0x6] sm:$0x3]  ;;  %v578_v47 = vrot.slane %v1209_v42, %v1442_v43  ;;  %v582_v48 = vrot.slane %v1209_v42, %v1444_v44  ;;  %v1210_v50 = vld [vmem:[%s1669_s3 + $0x4] sm:$0x3]  ;;  %vm546_vm5 = vcmp.lt.s32.totalorder %v1437_v38, 17  ;;  %v554_v55 = vrot.slane %v549_v45, %v1442_v43 }
   0xe   : > { %s1195_s29 = sshll.u32 %s1678_s14, 2  ;;  %s1230_s19 = sshll.u32 %s1678_s14, 3  ;;  %v558_v56 = vrot.slane %v549_v45, %v1444_v44  ;;  %vm617_vm6 = vcmp.lt.s32.totalorder %v1437_v38, 1  ;;  %v630_v57 = vrot.slane %v1211_v46, %v1444_v44  ;;  %v606_v58 = vrot.slane %v1210_v50, %v1444_v44  ;;  %v1212_v0 = vld [vmem:[%s1669_s3 + $0x8] sm:$0x3] }
   0xf   : > { %s371_s16 = scalar_lea.vmem %s1667_s1, %s1195_s29  ;;  %s367_s22 = scalar_lea.vmem %s1666_s0, %s1230_s19  ;;  %v626_v59 = vrot.slane %v1211_v46, %v1442_v43  ;;  %vm658_vm7 = vcmp.lt.s32.totalorder %v1437_v38, 127  ;;  %v671_v1 = vrot.slane %v1213_v54, %v1444_v44  ;;  %v602_v10 = vrot.slane %v1210_v50, %v1442_v43 }
  0x10   : > { %436 = vmatpush1.bf16.msra.mxu0 %v1259_v6  ;;  %v378_v9 = vld [vmem:[%s371_s16] sm:$0xf]  ;;  %s1276_s29 = smov 127   ;;  %vm682_vm8 = vcmp.lt.s32.totalorder %v1437_v38, 113  ;;  %vm706_vm9 = vcmp.lt.s32.totalorder %v1437_v38, 112  ;;  %vm730_vm10 = vcmp.lt.s32.totalorder %v1437_v38, 111 }
  0x11   : > { %437 = vmatprep.subr.bf16.mxu0 %v1260_v7  ;;  %v472_v11 = vld [vmem:[%s367_s22] sm:$0xff]  ;;  %vm1069_vm12 = vcmask 654336  }
  0x12   : > { %v473_v12 = vunpack.c.l.bf16 %v472_v11  ;;  %v474_v13 = vunpack.c.h.bf16 %v472_v11  ;;  %v647_v11 = vrot.slane %v1212_v0, %v1444_v44 }
  0x14   : > { %438 = vmatpush1.bf16.msra.mxu0 %v1262_v8 }
  0x17   : > { %1206 = vmatmul.mubr.msk.bf16.vlgmr.msra.gmra.mrb[0].mxu0 %vm427_vm0, %v378_v9 }
  0x18   : > { %1105 = vmatprep.mubr.bf16.mxu0 %v1271_v2 }
  0x88   : > { %v484_v24 = vpop.permute.xlu0 %483 }
  0xea   : > { %v465_v14 = vpop.f32.mrb[0].mxu0 }
  0xeb   : > { %v1382_v15 = vadd.f32 %v473_v12, %v465_v14  ;;  %v467_v16 = vpop.f32.mrb[1].mxu0 }
  0xec   : > { %v1384_v17 = vadd.f32 %v474_v13, %v467_v16  ;;  %v469_v18 = vpop.f32.mrb[2].mxu0 }
  0xed   : > { %v470_v19 = vpop.f32.mrb[3].mxu0  ;;  %v477_v20 = vpack.c.bf16 %v1382_v15, %v1382_v15 }
  0xee   : > { %v478_v21 = vpack.c.bf16 %v1384_v17, %v1384_v17 }
  0xef   : > { %v492_v22 = vsel %vm490_vm1, %v477_v20, 0 }
  0xf0   : > { %1207 = vmatprep.subr.msk.bf16.mxu1 %vm490_vm1, %v478_v21  ;;  %v667_v21 = vrot.slane %v1213_v54, %v1442_v43 }
  0xf1   : > { %498 = vmatpush1.bf16.msra.mxu1 %v492_v22 }
  0xf4   : > { %1208 = vmatmul.mubr.msk.bf16.vlgmr.msra.gmra.mrb[0].mxu1 %vm486_vm2, %v479_v23 }
  0xf5   : > { %827 = vmatprep.mubr.bf16.mxu1 %v1271_v2 }
 0x1c7   : > { %v531_v25 = vpop.f32.mrb[0].mxu1 }
 0x1c8   : > { %v532_v26 = vadd.f32 %v531_v25, %v484_v24  ;;  %v533_v27 = vpop.f32.mrb[1].mxu1 }
 0x1c9   : > { %v535_v28 = vpop.f32.mrb[2].mxu1  ;;  %v534_v30 = vadd.f32 %v533_v27, %v484_v24 }
 0x1ca   : > { %v1395_v29 = vmax.f32 %v532_v26, 0.0  ;;  %v536_v31 = vpop.f32.mrb[3].mxu1  ;;  %v1214_v26 = vld [vmem:[%s1669_s3 + $0xc] sm:$0x3]  ;;  %v643_v28 = vrot.slane %v1212_v0, %v1442_v43 }
 0x1cb   : > { %v1399_v32 = vmax.f32 %v534_v30, 0.0  ;;  %v1215_v30 = vld [vmem:[%s1669_s3 + $0xe] sm:$0x3]  ;;  %v695_v39 = vrot.slane %v1214_v26, %v1444_v44 }
 0x1cc   : > { %565 = vrot.lane.b32.xlu1 %v1395_v29, %s1272_s25  ;;  %540 = vrot.lane.b32.xlu0 %v1395_v29, %s1273_s26  ;;  %v715_v42 = vrot.slane %v1215_v30, %v1442_v43  ;;  %v719_v45 = vrot.slane %v1215_v30, %v1444_v44  ;;  %v650_v46 = vmul.f32 %v643_v28, %v1395_v29 }
 0x1d0   : > { %589 = vrot.lane.b32.xlu1 %v1395_v29, %s1274_s27  ;;  %567 = vrot.lane.b32.xlu0 %v1399_v32, %s1272_s25 }
 0x1d4   : > { %613 = vrot.lane.b32.xlu1 %v1395_v29, %s1275_s28  ;;  %591 = vrot.lane.b32.xlu0 %v1399_v32, %s1274_s27 }
 0x1d8   : > { %542 = vrot.lane.b32.xlu1 %v1399_v32, %s1273_s26  ;;  %615 = vrot.lane.b32.xlu0 %v1399_v32, %s1275_s28 }
 0x1dc   : > { %654 = vrot.lane.b32.xlu1 %v1395_v29, %s1276_s29  ;;  %656 = vrot.lane.b32.xlu0 %v1399_v32, %s1276_s29 }
 0x1e0   : > { %678 = vrot.lane.b32.xlu1 %v1395_v29, %s1277_s30  ;;  %680 = vrot.lane.b32.xlu0 %v1399_v32, %s1277_s30 }
 0x1e4   : > { %702 = vrot.lane.b32.xlu1 %v1395_v29, %s1278_s11  ;;  %704 = vrot.lane.b32.xlu0 %v1399_v32, %s1278_s11 }
 0x1e8   : > { %726 = vrot.lane.b32.xlu1 %v1395_v29, %s1279_s12  ;;  %728 = vrot.lane.b32.xlu0 %v1399_v32, %s1279_s12 }
 0x1ec   : > { %782 = vperm.xlu1 %1250, %v779_v33   ;;  %840 = vrot.lane.b32.xlu0 %v1382_v15, %s1273_s26 }
 0x1f0   : > { %842 = vrot.lane.b32.xlu1 %v1384_v17, %s1273_s26  ;;  %862 = vrot.lane.b32.xlu0 %v1382_v15, %s1272_s25 }
 0x1f4   : > { %864 = vrot.lane.b32.xlu1 %v1384_v17, %s1272_s25  ;;  %884 = vrot.lane.b32.xlu0 %v1382_v15, %s1274_s27 }
 0x1f8   : > { %886 = vrot.lane.b32.xlu1 %v1384_v17, %s1274_s27  ;;  %906 = vrot.lane.b32.xlu0 %v1382_v15, %s1275_s28 }
 0x1fc   : > { %908 = vrot.lane.b32.xlu1 %v1384_v17, %s1275_s28  ;;  %944 = vrot.lane.b32.xlu0 %v1382_v15, %s1276_s29  ;;  %s376_s28 = scalar_lea.vmem %s1676_s10, %s1230_s19 }
 0x200   : > { %946 = vrot.lane.b32.xlu1 %v1384_v17, %s1276_s29  ;;  %966 = vrot.lane.b32.xlu0 %v1382_v15, %s1277_s30 }
 0x204   : > { %968 = vrot.lane.b32.xlu1 %v1384_v17, %s1277_s30  ;;  %988 = vrot.lane.b32.xlu0 %v1382_v15, %s1278_s11 }
 0x208   : > { %990 = vrot.lane.b32.xlu1 %v1384_v17, %s1278_s11  ;;  %1010 = vrot.lane.b32.xlu0 %v1382_v15, %s1279_s12 }
 0x20c   : > { %1012 = vrot.lane.b32.xlu1 %v1384_v17, %s1279_s12  ;;  %1066 = vperm.xlu0 %1249, %v1063_v34   ;;  %v651_v34 = vmul.f32 %v647_v11, %v1399_v32  ;;  %v1219_v11 = vld [vmem:[%s1669_s3 + $0x2] sm:$0x3] }
 0x23e   : > { %v566_v36 = vpop.permute.xlu1 %565  ;;  %v541_v37 = vpop.permute.xlu0 %540 }
 0x242   : > { %v590_v40 = vpop.permute.xlu1 %589  ;;  %v568_v41 = vpop.permute.xlu0 %567 }
 0x243   : > { %v570_v52 = vsel %vm569_vm3, %v566_v36, %v568_v41  ;;  %v571_v53 = vsel %vm569_vm3, %v568_v41, %v566_v36 }
 0x244   : > { %v585_v60 = vmul.f32 %v578_v47, %v571_v53  ;;  %v586_v61 = vmul.f32 %v582_v48, %v570_v52 }
 0x246   : > { %v614_v49 = vpop.permute.xlu1 %613  ;;  %v592_v51 = vpop.permute.xlu0 %591 }
 0x247   : > { %v594_v2 = vsel %vm593_vm4, %v590_v40, %v592_v51  ;;  %v595_v12 = vsel %vm593_vm4, %v592_v51, %v590_v40  ;;  %v1216_v40 = vld [vmem:[%s1669_s3 + $0x10] sm:$0x3] }
 0x248   : > { %v610_v13 = vmul.f32 %v606_v58, %v594_v2  ;;  %v609_v27 = vmul.f32 %v602_v10, %v595_v12  ;;  %v739_v50 = vrot.slane %v1216_v40, %v1442_v43  ;;  %v743_v53 = vrot.slane %v1216_v40, %v1444_v44  ;;  %v1220_v12 = vld [vmem:[%s1669_s3 + $0x4] sm:$0x3] }
 0x24a   : > { %v543_v62 = vpop.permute.xlu1 %542  ;;  %v616_v63 = vpop.permute.xlu0 %615 }
 0x24b   : > { %v547_v3 = vsel %vm546_vm5, %v541_v37, %v543_v62  ;;  %v548_v4 = vsel %vm546_vm5, %v543_v62, %v541_v37  ;;  %v618_v5 = vsel %vm617_vm6, %v614_v49, %v616_v63  ;;  %v619_v8 = vsel %vm617_vm6, %v616_v63, %v614_v49 }
 0x24c   : > { %v561_v6 = vmul.f32 %v554_v55, %v548_v4  ;;  %v562_v7 = vmul.f32 %v558_v56, %v547_v3  ;;  %v634_v9 = vmul.f32 %v630_v57, %v618_v5  ;;  %v633_v20 = vmul.f32 %v626_v59, %v619_v8 }
 0x24d   : > { %v691_v37 = vrot.slane %v1214_v26, %v1442_v43 }
 0x24e   : > { %v769_v14 = vpack.c.bf16 %v585_v60, %v561_v6  ;;  %v655_v16 = vpop.permute.xlu1 %654  ;;  %v657_v18 = vpop.permute.xlu0 %656  ;;  %v770_v19 = vpack.c.bf16 %v586_v61, %v562_v7  ;;  %v772_v25 = vpack.c.bf16 %v634_v9, %v610_v13  ;;  %v771_v35 = vpack.c.bf16 %v633_v20, %v609_v27  ;;  %v750_v6 = vld [vmem:[%s1672_s6] sm:$0xf] }
 0x24f   : > { %v660_v22 = vsel %vm658_vm7, %v657_v18, %v655_v16  ;;  %v659_v23 = vsel %vm658_vm7, %v655_v16, %v657_v18  ;;  %v873_v16 = vrot.slane %v1219_v11, %v1442_v43  ;;  %v877_v18 = vrot.slane %v1219_v11, %v1444_v44 }
 0x250   : > { %v675_v24 = vmul.f32 %v671_v1, %v660_v22  ;;  %795 = vmatprep.subr.bf16.mxu1 %v770_v19  ;;  %v674_v36 = vmul.f32 %v667_v21, %v659_v23  ;;  %v895_v19 = vrot.slane %v1220_v12, %v1442_v43  ;;  %v899_v20 = vrot.slane %v1220_v12, %v1444_v44 }
 0x251   : > { %796 = vmatpush1.bf16.msra.mxu1 %v769_v14 }
 0x252   : > { %v679_v31 = vpop.permute.xlu1 %678  ;;  %797 = vmatprep.subr.bf16.mxu1 %v772_v25  ;;  %v681_v33 = vpop.permute.xlu0 %680  ;;  %v774_v41 = vpack.c.bf16 %v675_v24, %v651_v34  ;;  %v773_v51 = vpack.c.bf16 %v674_v36, %v650_v46  ;;  %v1223_v36 = vld [vmem:[%s1669_s3 + $0xa] sm:$0x3] }
 0x253   : > { %v683_v32 = vsel %vm682_vm8, %v679_v31, %v681_v33  ;;  %v684_v47 = vsel %vm682_vm8, %v681_v33, %v679_v31 }
 0x254   : > { %v698_v54 = vmul.f32 %v691_v37, %v683_v32  ;;  %v699_v55 = vmul.f32 %v695_v39, %v684_v47  ;;  %v1224_v37 = vld [vmem:[%s1669_s3 + $0xc] sm:$0x3] }
 0x255   : > { %798 = vmatpush1.bf16.msra.mxu1 %v771_v35  ;;  %v981_v46 = vrot.slane %v1224_v37, %v1444_v44 }
 0x256   : > { %v703_v48 = vpop.permute.xlu1 %702  ;;  %799 = vmatprep.subr.bf16.mxu1 %v774_v41  ;;  %v705_v49 = vpop.permute.xlu0 %704  ;;  %v955_v41 = vrot.slane %v1223_v36, %v1442_v43 }
 0x257   : > { %v707_v52 = vsel %vm706_vm9, %v703_v48, %v705_v49  ;;  %v708_v29 = vsel %vm706_vm9, %v705_v49, %v703_v48 }
 0x258   : > { %v722_v56 = vmul.f32 %v715_v42, %v707_v52  ;;  %v723_v57 = vmul.f32 %v719_v45, %v708_v29  ;;  %v959_v42 = vrot.slane %v1223_v36, %v1444_v44  ;;  %v977_v45 = vrot.slane %v1224_v37, %v1442_v43 }
 0x259   : > { %800 = vmatpush1.bf16.msra.mxu1 %v773_v51 }
 0x25a   : > { %v775_v58 = vpack.c.bf16 %v722_v56, %v698_v54  ;;  %v727_v59 = vpop.permute.xlu1 %726  ;;  %v729_v60 = vpop.permute.xlu0 %728  ;;  %v776_v61 = vpack.c.bf16 %v723_v57, %v699_v55  ;;  %v1225_v55 = vld [vmem:[%s1669_s3 + $0xe] sm:$0x3]  ;;  %v1226_v56 = vld [vmem:[%s1669_s3 + $0x10] sm:$0x3] }
 0x25b   : > { %v731_v62 = vsel %vm730_vm10, %v727_v59, %v729_v60  ;;  %v732_v63 = vsel %vm730_vm10, %v729_v60, %v727_v59  ;;  %v999_v60 = vrot.slane %v1225_v55, %v1442_v43 }
 0x25c   : > { %v746_v0 = vmul.f32 %v739_v50, %v731_v62  ;;  %v747_v1 = vmul.f32 %v743_v53, %v732_v63  ;;  %801 = vmatprep.subr.bf16.mxu1 %v776_v61  ;;  %v1003_v61 = vrot.slane %v1225_v55, %v1444_v44  ;;  %v1021_v62 = vrot.slane %v1226_v56, %v1442_v43 }
 0x25d   : > { %802 = vmatpush1.bf16.msra.mxu1 %v775_v58  ;;  %v1025_v63 = vrot.slane %v1226_v56, %v1444_v44 }
 0x25e   : > { %v777_v2 = vpack.c.bf16 %v746_v0, %v746_v0  ;;  %v778_v3 = vpack.c.bf16 %v747_v1, %v747_v1  ;;  %v1532_v5 = vpop.permute.xlu0 %840 }
 0x260   : > { %1217 = vmatprep.subr.msk.bf16.mxu1 %vm490_vm1, %v778_v3  ;;  %v790_v4 = vsel %vm490_vm1, %v777_v2, 0 }
 0x261   : > { %804 = vmatpush1.bf16.msra.mxu1 %v790_v4 }
 0x262   : > { %v863_v7 = vpop.permute.xlu0 %862 }
 0x264   : > { %1218 = vmatmul.mubr.msk.bf16.vlgmr.msra.gmra.mrb[4].mxu1 %vm785_vm11, %v750_v6 }
 0x266   : > { %v885_v9 = vpop.permute.xlu0 %884 }
 0x26a   : > { %v1547_v13 = vpop.permute.xlu0 %906 }
 0x26b   : > { %v1537_v8 = vpop.permute.xlu1 %782 }
 0x26e   : > { %v945_v26 = vpop.permute.xlu0 %944 }
 0x26f   : > { %v1539_v10 = vpop.permute.xlu1 %842 }
 0x272   : > { %v967_v39 = vpop.permute.xlu0 %966 }
 0x273   : > { %v865_v14 = vpop.permute.xlu1 %864 }
 0x274   : > { %v866_v21 = vsel %vm569_vm3, %v863_v7, %v865_v14  ;;  %v867_v22 = vsel %vm569_vm3, %v865_v14, %v863_v7 }
 0x275   : > { %v1561_v27 = vmul.f32 %v873_v16, %v867_v22  ;;  %v1563_v28 = vmul.f32 %v877_v18, %v866_v21  ;;  %v846_v18 = vld [vmem:[%s1669_s3] sm:$0x3]  ;;  %v845_v21 = vsel %vm546_vm5, %v1539_v10, %v1532_v5 }
 0x276   : > { %v989_v51 = vpop.permute.xlu0 %988 }
 0x277   : > { %v887_v23 = vpop.permute.xlu1 %886 }
 0x278   : > { %v888_v24 = vsel %vm593_vm4, %v885_v9, %v887_v23  ;;  %v889_v25 = vsel %vm593_vm4, %v887_v23, %v885_v9  ;;  %v844_v23 = vsel %vm546_vm5, %v1532_v5, %v1539_v10 }
 0x279   : > { %v1565_v30 = vmul.f32 %v895_v19, %v889_v25  ;;  %v1567_v31 = vmul.f32 %v899_v20, %v888_v24  ;;  %v851_v19 = vrot.slane %v846_v18, %v1442_v43  ;;  %v855_v20 = vrot.slane %v846_v18, %v1444_v44  ;;  %v1221_v24 = vld [vmem:[%s1669_s3 + $0x6] sm:$0x3] }
 0x27a   : > { %v1011_v2 = vpop.permute.xlu0 %1010  ;;  %v921_v5 = vrot.slane %v1221_v24, %v1444_v44 }
 0x27b   : > { %v1055_v33 = vpack.c.bf16 %v1565_v30, %v1561_v27  ;;  %v1571_v34 = vpop.permute.xlu1 %908  ;;  %v1056_v35 = vpack.c.bf16 %v1567_v31, %v1563_v28 }
 0x27f   : > { %v947_v40 = vpop.permute.xlu1 %946 }
 0x280   : > { %v948_v32 = vsel %vm658_vm7, %v945_v26, %v947_v40  ;;  %v949_v47 = vsel %vm658_vm7, %v947_v40, %v945_v26  ;;  %v1222_v40 = vld [vmem:[%s1669_s3 + $0x8] sm:$0x3] }
 0x281   : > { %v1593_v52 = vmul.f32 %v955_v41, %v948_v32  ;;  %v963_v29 = vmul.f32 %v959_v42, %v949_v47 }
 0x283   : > { %v969_v48 = vpop.permute.xlu1 %968 }
 0x284   : > { %v970_v49 = vsel %vm682_vm8, %v967_v39, %v969_v48  ;;  %v971_v50 = vsel %vm682_vm8, %v969_v48, %v967_v39  ;;  %v858_v39 = vmul.f32 %v851_v19, %v845_v21  ;;  %v917_v48 = vrot.slane %v1221_v24, %v1442_v43 }
 0x285   : > { %v984_v53 = vmul.f32 %v977_v45, %v970_v49  ;;  %v985_v54 = vmul.f32 %v981_v46, %v971_v50  ;;  %v859_v45 = vmul.f32 %v855_v20, %v844_v23  ;;  %v910_v46 = vsel %vm617_vm6, %v1547_v13, %v1571_v34 }
 0x286   : > { %v911_v49 = vsel %vm617_vm6, %v1571_v34, %v1547_v13  ;;  %v925_v50 = vmul.f32 %v921_v5, %v910_v46 }
 0x287   : > { %v1059_v57 = vpack.c.bf16 %v984_v53, %v1593_v52  ;;  %v991_v58 = vpop.permute.xlu1 %990  ;;  %v1060_v59 = vpack.c.bf16 %v985_v54, %v963_v29  ;;  %v924_v29 = vmul.f32 %v917_v48, %v911_v49 }
 0x288   : > { %v992_v0 = vsel %vm706_vm9, %v989_v51, %v991_v58  ;;  %v993_v1 = vsel %vm706_vm9, %v991_v58, %v989_v51  ;;  %v933_v51 = vrot.slane %v1222_v40, %v1442_v43 }
 0x289   : > { %v1006_v7 = vmul.f32 %v999_v60, %v992_v0  ;;  %v1007_v9 = vmul.f32 %v1003_v61, %v993_v1 }
 0x28a   : > { %v940_v53 = vmul.f32 %v933_v51, %v1382_v15 }
 0x28b   : > { %v1013_v3 = vpop.permute.xlu1 %1012  ;;  %v1067_v43 = vpop.permute.xlu0 %1066 }
 0x28c   : > { %v1014_v4 = vsel %vm730_vm10, %v1011_v2, %v1013_v3  ;;  %v1015_v6 = vsel %vm730_vm10, %v1013_v3, %v1011_v2  ;;  %v1057_v38 = vpack.c.bf16 %v940_v53, %v924_v29 }
 0x28d   : > { %v1028_v11 = vmul.f32 %v1021_v62, %v1014_v4  ;;  %v1029_v12 = vmul.f32 %v1025_v63, %v1015_v6 }
 0x28f   : > { %v1061_v14 = vpack.c.bf16 %v1028_v11, %v1006_v7  ;;  %v1062_v16 = vpack.c.bf16 %v1029_v12, %v1007_v9 }
 0x337   : > { %v829_v22 = vpop.f32.mrb[4].mxu1 }
 0x338   : > { %v830_v25 = vadd.f32 %v829_v22, %v1537_v8  ;;  %v831_v26 = vpop.f32.mrb[5].mxu1 }
 0x339   : > { %v832_v36 = vadd.f32 %v831_v26, %v1537_v8  ;;  %v833_v37 = vpop.f32.mrb[6].mxu1  ;;  %v937_v8 = vrot.slane %v1222_v40, %v1444_v44 }
 0x33a   : > { %v836_v41 = vmax.f32 %v830_v25, 0.0  ;;  %v834_v42 = vpop.f32.mrb[7].mxu1 }
 0x33b   : > { %v837_v10 = vmax.f32 %v832_v36, 0.0  ;;  %v941_v52 = vmul.f32 %v937_v8, %v1384_v17  ;;  %v1032_v17 = vld [vmem:[%s1674_s8] sm:$0x3] }
 0x33c   : > { %v1053_v32 = vpack.c.bf16 %v858_v39, %v836_v41 }
 0x33d   : > { %v1054_v47 = vpack.c.bf16 %v859_v45, %v837_v10  ;;  %v1058_v44 = vpack.c.bf16 %v941_v52, %v925_v50 }
 0x33f   : > { %1073 = vmatprep.subr.bf16.mxu0 %v1054_v47 }
 0x340   : > { %1074 = vmatpush1.bf16.msra.mxu0 %v1053_v32 }
 0x341   : > { %1075 = vmatprep.subr.bf16.mxu0 %v1056_v35 }
 0x344   : > { %1076 = vmatpush1.bf16.msra.mxu0 %v1055_v33 }
 0x345   : > { %1077 = vmatprep.subr.bf16.mxu0 %v1058_v44 }
 0x348   : > { %1078 = vmatpush1.bf16.msra.mxu0 %v1057_v38 }
 0x349   : > { %1079 = vmatprep.subr.bf16.mxu0 %v1060_v59 }
 0x34c   : > { %1080 = vmatpush1.bf16.msra.mxu0 %v1059_v57 }
 0x34d   : > { %1081 = vmatprep.subr.bf16.mxu0 %v1062_v16 }
 0x350   : > { %1082 = vmatpush1.bf16.msra.mxu0 %v1061_v14 }
 0x353   : > { %1227 = vmatmul.mubr.msk.bf16.vlgmr.msra.gmra.mrb[4].mxu0 %vm1069_vm12, %v1032_v17 }
 0x426   : > { %v1107_v15 = vpop.f32.mrb[4].mxu0 }
 0x427   : > { %v1108_v13 = vadd.f32 %v1107_v15, %v1067_v43  ;;  %v1109_v28 = vpop.f32.mrb[5].mxu0 }
 0x428   : > { %v1110_v27 = vadd.f32 %v1109_v28, %v1067_v43  ;;  %v1111_v30 = vpop.f32.mrb[6].mxu0 }
 0x429   : > { %v1114_v31 = vmax.f32 %v1108_v13, 0.0  ;;  %v1112_v33 = vpop.f32.mrb[7].mxu0 }
 0x42a   : > { %v1115_v34 = vmax.f32 %v1110_v27, 0.0 }
 0x42c   : > { %v1118_v35 = vcombine.low %v1114_v31, %v1115_v34 }
 0x42e   : > { %1120 = vst [vmem:[%s376_s28] sm:$0xff] %v1118_v35 }
 0x42f PF: > { %s20_s13 = sadd.s32 1, %s1269_s13  }
 0x430   : > { %p17_p4 = scmp.ge.s32.totalorder %s20_s13, 4  }
 0x432   :  { %19 = sbr.rel (!%p17_p4) target bundleno = 1 (0x1), region = 101 }

</bundles_post_ra>
